<compile_context>
chip_gen: v5e
topology: v5e:2x2
jax: 0.10.0
libtpu: 0.0.40
codegen_flags: <defaults>
</compile_context>

<pallas_src>
import functools

import jax
import jax.numpy as jnp
from jax import lax
from jax.experimental import pallas as pl
from jax.experimental.pallas import tpu as pltpu

SLOPE = 0.01


def _feature_extractor_kernel(u_ref, w_ref, b_ref, w3_ref, out_ref,
                              tr_acc, tot_acc, *, f_in):
    i = pl.program_id(1)
    n_i = pl.num_programs(1)
    tb, tni, nf = u_ref.shape

    @pl.when(i == 0)
    def _init():
        tr_acc[...] = jnp.zeros_like(tr_acc)
        tot_acc[...] = jnp.zeros_like(tot_acc)

    # One fused pass over the tile: total sum + diagonal (trace) contribution.
    u_t = u_ref[...].astype(jnp.float32)                   # (tb, tni, N*F_in)
    i0 = i * tni                                           # global row offset
    row = lax.broadcasted_iota(jnp.int32, (tni, nf), 0) + i0
    lane = lax.broadcasted_iota(jnp.int32, (tni, nf), 1)
    # lane l belongs to node_j = l // f_in; diagonal iff node_j == global row i
    diag_mask = ((lane >= row * f_in) & (lane < (row + 1) * f_in)
                 ).astype(jnp.float32)                     # (tni, N*F_in)

    tot_acc[...] += jnp.sum(u_t, axis=1)                   # (tb, N*F_in)
    tr_acc[...] += jnp.sum(u_t * diag_mask[None], axis=1)  # (tb, N*F_in)

    @pl.when(i == n_i - 1)
    def _finalize():
        # [trace_acc, total_acc] @ w_comb reproduces lin1(trace/N)+lin2(s)+b1
        # (all N-dependent scaling folded into w_comb host-side).
        x = jnp.concatenate([tr_acc[...], tot_acc[...]], axis=-1)  # (tb, 2*N*F_in)
        pre = jnp.dot(x, w_ref[...],
                      preferred_element_type=jnp.float32) + b_ref[...]
        act = jnp.where(pre > 0, pre, SLOPE * pre)                 # LeakyReLU
        out = pre + jnp.dot(act, w3_ref[...],
                            preferred_element_type=jnp.float32)
        out_ref[...] = out.astype(out_ref.dtype)


def _pick_batch_tile(B):
    if B <= 8 or B % 8 != 0:
        return B
    return 8


def _pick_node_tile(N, tb, nf, node_tile, budget_bytes=8 * 2**20):
    if node_tile is not None and N % node_tile == 0 and (
            node_tile == N or node_tile % 8 == 0):
        return node_tile
    if N % 8 != 0:
        return N                      # fall back to full axis (valid block)
    best = 8
    for t in range(8, N + 1, 8):
        if N % t == 0 and 2 * tb * t * nf * 4 <= budget_bytes:
            best = t
    return best


def feature_extractor(u, w1_t, b1, w2_t, w3_t, *, node_tile=None):
    """u: (B, N, N, F_in); w1_t/w2_t: (F_in, F_out); b1: (1, F_out); w3_t: (F_out, F_out)."""
    B, N, _, F_in = u.shape
    F_out = w1_t.shape[1]
    NF = N * F_in

    # Lane-dense view: merge (node_j, feature) into the lane axis (free bitcast).
    u_flat = u.reshape(B, N, NF)

    # Fold scalings and fuse lin1/lin2:
    #   out_pre = trace @ (w1/N - w2/(N(N-1))) + total @ (w2/(N(N-1))) + b1
    # expressed against the lane-dense (node_j, feature) accumulators by row-tiling.
    s_tr = 1.0 / N
    s_mu = 1.0 / (N * (N - 1))
    w_tr = jnp.tile(w1_t * s_tr - w2_t * s_mu, (N, 1))     # (N*F_in, F_out)
    w_tot = jnp.tile(w2_t * s_mu, (N, 1))                  # (N*F_in, F_out)
    w_comb = jnp.concatenate([w_tr, w_tot], axis=0)        # (2*N*F_in, F_out)

    tb = _pick_batch_tile(B)
    tni = _pick_node_tile(N, tb, NF, node_tile)
    grid = (B // tb, N // tni)

    # VMEM budget: double-buffered u tile + weights + scratch + output (+margin).
    bytes_u_tile = 2 * tb * tni * NF * 4
    bytes_static = ((w_comb.size + b1.size + w3_t.size) * 4 * 2
                    + 2 * tb * NF * 4 + 2 * tb * F_out * 4)
    vmem_limit = int(min(max(2 * (bytes_u_tile + bytes_static), 32 * 2**20),
                         48 * 2**20))

    cost = pl.CostEstimate(
        flops=2 * B * N * N * F_in + 2 * B * (2 * NF * F_out + F_out * F_out),
        transcendentals=0,
        bytes_accessed=(u.size + w_comb.size + b1.size + w3_t.size
                        + B * F_out) * 4,
    )

    kernel = functools.partial(_feature_extractor_kernel, f_in=F_in)
    return pl.pallas_call(
        kernel,
        out_shape=jax.ShapeDtypeStruct((B, F_out), jnp.float32),
        grid_spec=pltpu.PrefetchScalarGridSpec(
            num_scalar_prefetch=0,
            grid=grid,
            in_specs=[
                pl.BlockSpec((tb, tni, NF), lambda b, i: (b, i, 0)),
                pl.BlockSpec((2 * NF, F_out), lambda b, i: (0, 0)),
                pl.BlockSpec((1, F_out), lambda b, i: (0, 0)),
                pl.BlockSpec((F_out, F_out), lambda b, i: (0, 0)),
            ],
            out_specs=pl.BlockSpec((tb, F_out), lambda b, i: (b, 0)),
            scratch_shapes=[
                pltpu.VMEM((tb, NF), jnp.float32),   # trace partials (per j,f)
                pltpu.VMEM((tb, NF), jnp.float32),   # total partials (per j,f)
            ],
        ),
        compiler_params=pltpu.CompilerParams(
            dimension_semantics=("parallel", "arbitrary"),
            vmem_limit_bytes=vmem_limit,
        ),
        cost_estimate=cost,
    )(u_flat, w_comb, b1, w3_t)


def reference_forward(u, w1_t, b1, w2_t, w3_t):
    """Pure-JAX reference mirroring the PyTorch module (f32-exact matmuls)."""
    B, N, _, F_in = u.shape
    hp = lax.Precision.HIGHEST
    trace = jnp.einsum("biif->bf", u)                   # sum of diagonal
    total = jnp.sum(u, axis=(1, 2))
    s = (total - trace) / (N * (N - 1))
    out1 = jnp.dot(trace / N, w1_t, precision=hp) + b1
    out2 = jnp.dot(s, w2_t, precision=hp)
    out = out1 + out2
    act = jnp.where(out > 0, out, SLOPE * out)
    return out + jnp.dot(act, w3_t, precision=hp)


if __name__ == "__main__":
    B, N, F_in, F_out = 2, 32, 16, 32

    key = jax.random.PRNGKey(0)
    k_u, k_w1, k_b1, k_w2, k_w3 = jax.random.split(key, 5)

    u = jax.random.normal(k_u, (B, N, N, F_in), dtype=jnp.float32)

    # Deterministic PyTorch-Linear-like init, stored pre-transposed: (in, out).
    bound1 = 1.0 / (F_in ** 0.5)
    bound3 = 1.0 / (F_out ** 0.5)
    w1_t = jax.random.uniform(k_w1, (F_in, F_out), jnp.float32, -bound1, bound1)
    b1 = jax.random.uniform(k_b1, (1, F_out), jnp.float32, -bound1, bound1)
    w2_t = jax.random.uniform(k_w2, (F_in, F_out), jnp.float32, -bound1, bound1)
    w3_t = jax.random.uniform(k_w3, (F_out, F_out), jnp.float32, -bound3, bound3)

    # node_tile=8 -> grid (1, 4): exercises the tiled accumulate/finalize path.
    out = feature_extractor(u, w1_t, b1, w2_t, w3_t, node_tile=8)
    out = jax.block_until_ready(out)

    ref = reference_forward(u, w1_t, b1, w2_t, w3_t)
    assert out.shape == (B, F_out)
    assert jnp.allclose(out, ref, atol=1e-4, rtol=1e-4), "mismatch vs reference"

    print("KERNEL_OK")
</pallas_src>

<mosaic_0001>
module attributes {stable_mosaic.version = 11 : i64} {
  func.func @_feature_extractor_kernel(%arg0: i32, %arg1: i32, %arg2: memref<2x8x512xf32, #tpu.memory_space<vmem>>, %arg3: memref<1024x32xf32, #tpu.memory_space<vmem>>, %arg4: memref<1x32xf32, #tpu.memory_space<vmem>>, %arg5: memref<32x32xf32, #tpu.memory_space<vmem>>, %arg6: memref<2x32xf32, #tpu.memory_space<vmem>>, %arg7: memref<2x512xf32, #tpu.memory_space<vmem>>, %arg8: memref<2x512xf32, #tpu.memory_space<vmem>>) attributes {dimension_semantics = [#tpu.dimension_semantics<parallel>, #tpu.dimension_semantics<arbitrary>], iteration_bounds = array<i64: 1, 4>, scalar_prefetch = 0 : i64, scratch_operands = 2 : i64, tpu.core_type = #tpu.core_type<tc>, window_params = [{transform_indices = @transform_0, window_bounds = array<i64: 2, 8, 512>}, {pipeline_mode = #tpu.pipeline_mode<synchronous>, transform_indices = @transform_1, window_bounds = array<i64: 1024, 32>}, {pipeline_mode = #tpu.pipeline_mode<synchronous>, transform_indices = @transform_2, window_bounds = array<i64: 1, 32>}, {pipeline_mode = #tpu.pipeline_mode<synchronous>, transform_indices = @transform_3, window_bounds = array<i64: 32, 32>}, {transform_indices = @transform_4, window_bounds = array<i64: 2, 32>}]} {
    %c0_i32 = arith.constant 0 : i32
    %0 = arith.cmpi eq, %arg1, %c0_i32 : i32
    %1 = arith.extui %0 : i1 to i32
    %c0_i32_0 = arith.constant 0 : i32
    %2 = arith.cmpi ne, %1, %c0_i32_0 : i32
    scf.if %2 {
      %cst_14 = arith.constant 0.000000e+00 : f32
      %34 = vector.broadcast %cst_14 : f32 to vector<2x512xf32>
      %c0_15 = arith.constant 0 : index
      %c0_16 = arith.constant 0 : index
      %35 = vector.load %arg7[%c0_15, %c0_16] : memref<2x512xf32, #tpu.memory_space<vmem>>, vector<2x512xf32>
      tpu.vector_store %arg7[%c0_15, %c0_16], %34 {strides = array<i32>} : memref<2x512xf32, #tpu.memory_space<vmem>>, vector<2x512xf32>,
      %cst_17 = arith.constant 0.000000e+00 : f32
      %36 = vector.broadcast %cst_17 : f32 to vector<2x512xf32>
      %c0_18 = arith.constant 0 : index
      %c0_19 = arith.constant 0 : index
      %37 = vector.load %arg8[%c0_18, %c0_19] : memref<2x512xf32, #tpu.memory_space<vmem>>, vector<2x512xf32>
      tpu.vector_store %arg8[%c0_18, %c0_19], %36 {strides = array<i32>} : memref<2x512xf32, #tpu.memory_space<vmem>>, vector<2x512xf32>,
    } else {
    }
    %c0 = arith.constant 0 : index
    %c0_1 = arith.constant 0 : index
    %c0_2 = arith.constant 0 : index
    %3 = vector.load %arg2[%c0, %c0_1, %c0_2] : memref<2x8x512xf32, #tpu.memory_space<vmem>>, vector<2x8x512xf32>
    %c8_i32 = arith.constant 8 : i32
    %4 = arith.muli %arg1, %c8_i32 : i32
    %5 = tpu.iota {dimensions = array<i32: 0>} : vector<8x512xi32>
    %6 = vector.broadcast %4 : i32 to vector<8x512xi32>
    %7 = arith.addi %5, %6 : vector<8x512xi32>
    %8 = tpu.iota {dimensions = array<i32: 1>} : vector<8x512xi32>
    %c16_i32 = arith.constant 16 : i32
    %9 = vector.broadcast %c16_i32 : i32 to vector<8x512xi32>
    %10 = arith.muli %7, %9 : vector<8x512xi32>
    %11 = arith.cmpi sge, %8, %10 : vector<8x512xi32>
    %c1_i32 = arith.constant 1 : i32
    %12 = vector.broadcast %c1_i32 : i32 to vector<8x512xi32>
    %13 = arith.addi %7, %12 : vector<8x512xi32>
    %c16_i32_3 = arith.constant 16 : i32
    %14 = vector.broadcast %c16_i32_3 : i32 to vector<8x512xi32>
    %15 = arith.muli %13, %14 : vector<8x512xi32>
    %16 = arith.cmpi slt, %8, %15 : vector<8x512xi32>
    %17 = arith.andi %11, %16 : vector<8x512xi1>
    %18 = arith.extui %17 : vector<8x512xi1> to vector<8x512xi32>
    %19 = arith.sitofp %18 : vector<8x512xi32> to vector<8x512xf32>
    %c0_4 = arith.constant 0 : index
    %c0_5 = arith.constant 0 : index
    %20 = vector.load %arg8[%c0_4, %c0_5] : memref<2x512xf32, #tpu.memory_space<vmem>>, vector<2x512xf32>
    %cst = arith.constant dense<0.000000e+00> : vector<2x512xf32>
    %21 = vector.multi_reduction <add>, %3, %cst [1] : vector<2x8x512xf32> to vector<2x512xf32>
    %22 = arith.addf %20, %21 : vector<2x512xf32>
    %c0_6 = arith.constant 0 : index
    %c0_7 = arith.constant 0 : index
    %23 = vector.load %arg8[%c0_6, %c0_7] : memref<2x512xf32, #tpu.memory_space<vmem>>, vector<2x512xf32>
    tpu.vector_store %arg8[%c0_6, %c0_7], %22 {strides = array<i32>} : memref<2x512xf32, #tpu.memory_space<vmem>>, vector<2x512xf32>,
    %c0_8 = arith.constant 0 : index
    %c0_9 = arith.constant 0 : index
    %24 = vector.load %arg7[%c0_8, %c0_9] : memref<2x512xf32, #tpu.memory_space<vmem>>, vector<2x512xf32>
    %25 = vector.shape_cast %19 : vector<8x512xf32> to vector<1x8x512xf32>
    %26 = vector.broadcast %25 : vector<1x8x512xf32> to vector<2x8x512xf32>
    %27 = arith.mulf %3, %26 : vector<2x8x512xf32>
    %cst_10 = arith.constant dense<0.000000e+00> : vector<2x512xf32>
    %28 = vector.multi_reduction <add>, %27, %cst_10 [1] : vector<2x8x512xf32> to vector<2x512xf32>
    %29 = arith.addf %24, %28 : vector<2x512xf32>
    %c0_11 = arith.constant 0 : index
    %c0_12 = arith.constant 0 : index
    %30 = vector.load %arg7[%c0_11, %c0_12] : memref<2x512xf32, #tpu.memory_space<vmem>>, vector<2x512xf32>
    tpu.vector_store %arg7[%c0_11, %c0_12], %29 {strides = array<i32>} : memref<2x512xf32, #tpu.memory_space<vmem>>, vector<2x512xf32>,
    %c3_i32 = arith.constant 3 : i32
    %31 = arith.cmpi eq, %arg1, %c3_i32 : i32
    %32 = arith.extui %31 : i1 to i32
    %c0_i32_13 = arith.constant 0 : i32
    %33 = arith.cmpi ne, %32, %c0_i32_13 : i32
    scf.if %33 {
      %c0_14 = arith.constant 0 : index
      %c0_15 = arith.constant 0 : index
      %34 = vector.load %arg7[%c0_14, %c0_15] : memref<2x512xf32, #tpu.memory_space<vmem>>, vector<2x512xf32>
      %c0_16 = arith.constant 0 : index
      %c0_17 = arith.constant 0 : index
      %35 = vector.load %arg8[%c0_16, %c0_17] : memref<2x512xf32, #tpu.memory_space<vmem>>, vector<2x512xf32>
      %36 = tpu.concatenate %34, %35 in 1 : vector<2x512xf32>, vector<2x512xf32> -> vector<2x1024xf32>
      %c0_18 = arith.constant 0 : index
      %c0_19 = arith.constant 0 : index
      %37 = vector.load %arg3[%c0_18, %c0_19] : memref<1024x32xf32, #tpu.memory_space<vmem>>, vector<1024x32xf32>
      %cst_20 = arith.constant dense<0.000000e+00> : vector<2x32xf32>
      %38 = tpu.matmul %36, %37, %cst_20 {dimension_numbers = #tpu.dot_dimension_numbers<[1], [0], [0], [1], [0, 0, 1, 1], [], []>} : vector<2x1024xf32>, vector<1024x32xf32>, vector<2x32xf32> -> vector<2x32xf32>
      %c0_21 = arith.constant 0 : index
      %c0_22 = arith.constant 0 : index
      %39 = vector.load %arg4[%c0_21, %c0_22] : memref<1x32xf32, #tpu.memory_space<vmem>>, vector<1x32xf32>
      %40 = vector.broadcast %39 : vector<1x32xf32> to vector<2x32xf32>
      %41 = arith.addf %38, %40 : vector<2x32xf32>
      %cst_23 = arith.constant 0.000000e+00 : f32
      %42 = vector.broadcast %cst_23 : f32 to vector<2x32xf32>
      %43 = arith.cmpf ogt, %41, %42 : vector<2x32xf32>
      %cst_24 = arith.constant 0.00999999977 : f32
      %44 = vector.broadcast %cst_24 : f32 to vector<2x32xf32>
      %45 = arith.mulf %44, %41 : vector<2x32xf32>
      %46 = arith.select %43, %41, %45 : vector<2x32xi1>, vector<2x32xf32>
      %c0_25 = arith.constant 0 : index
      %c0_26 = arith.constant 0 : index
      %47 = vector.load %arg5[%c0_25, %c0_26] : memref<32x32xf32, #tpu.memory_space<vmem>>, vector<32x32xf32>
      %cst_27 = arith.constant dense<0.000000e+00> : vector<2x32xf32>
      %48 = tpu.matmul %46, %47, %cst_27 {dimension_numbers = #tpu.dot_dimension_numbers<[1], [0], [0], [1], [0, 0, 1, 1], [], []>} : vector<2x32xf32>, vector<32x32xf32>, vector<2x32xf32> -> vector<2x32xf32>
      %49 = arith.addf %41, %48 : vector<2x32xf32>
      %c0_28 = arith.constant 0 : index
      %c0_29 = arith.constant 0 : index
      %50 = vector.load %arg6[%c0_28, %c0_29] : memref<2x32xf32, #tpu.memory_space<vmem>>, vector<2x32xf32>
      tpu.vector_store %arg6[%c0_28, %c0_29], %49 {strides = array<i32>} : memref<2x32xf32, #tpu.memory_space<vmem>>, vector<2x32xf32>,
    } else {
    }
    return
  }
  func.func @transform_0(%arg0: i32, %arg1: i32) -> (i32, i32, i32) {
    %c0_i32 = arith.constant 0 : i32
    %c0_i32_0 = arith.constant 0 : i32
    return %arg0, %arg1, %c0_i32 : i32, i32, i32
  }
  func.func @transform_1(%arg0: i32, %arg1: i32) -> (i32, i32) {
    %c0_i32 = arith.constant 0 : i32
    %c0_i32_0 = arith.constant 0 : i32
    %c0_i32_1 = arith.constant 0 : i32
    return %c0_i32, %c0_i32_0 : i32, i32
  }
  func.func @transform_2(%arg0: i32, %arg1: i32) -> (i32, i32) {
    %c0_i32 = arith.constant 0 : i32
    %c0_i32_0 = arith.constant 0 : i32
    %c0_i32_1 = arith.constant 0 : i32
    return %c0_i32, %c0_i32_0 : i32, i32
  }
  func.func @transform_3(%arg0: i32, %arg1: i32) -> (i32, i32) {
    %c0_i32 = arith.constant 0 : i32
    %c0_i32_0 = arith.constant 0 : i32
    %c0_i32_1 = arith.constant 0 : i32
    return %c0_i32, %c0_i32_0 : i32, i32
  }
  func.func @transform_4(%arg0: i32, %arg1: i32) -> (i32, i32) {
    %c0_i32 = arith.constant 0 : i32
    %c0_i32_0 = arith.constant 0 : i32
    return %arg0, %c0_i32 : i32, i32
  }
}

</mosaic_0001>

<bundles_post_ra>
// kernel: tpu_custom_call.1
= control target key start
LH: loop header
LB: loop body
LE: loop exit
PB: predicated region body
PF: predicated region fallthrough
CT: control target
= control target key end

     0   :  { %9 = vsyncpa [#allocation6], 0  ;;  %s1056_s15 = smov 0   ;;  %s1058_s16 = smov 0   ;;  %s1623_s0 = inlined_call_operand.vmem [shape: f32[2,32,512], index: 0, kind: input, shape index: {}]   ;;  %s1624_s1 = inlined_call_operand.vmem [shape: f32[1024,32], index: 1, kind: input, shape index: {}]   ;;  %s1625_s2 = inlined_call_operand.vmem [shape: f32[1,32], index: 2, kind: input, shape index: {}]   ;;  %s1626_s3 = inlined_call_operand.vmem [shape: f32[32,32], index: 3, kind: input, shape index: {}]   ;;  %s1627_s4 = inlined_call_operand.hbm [shape: f32[2,32], index: 4, kind: output, shape index: {}]  }
   0x1   :  { %s1060_s17 = smov 0   ;;  %s1062_s18 = smov 0  }
   0x2   :  { %s1064_s19 = smov 0  }
   0x3 LB: > { %s885_s20 = sadd.s32 4294967295, %s1026_s19   ;;  %s24_s21 = sadd.s32 1, %s1022_s18  ;;  %s1026_s19 = sphi %s1064_s19, %s15_s19   ;;  %s1022_s18 = sphi %s1062_s18, %s1639_s18   ;;  %s1018_s17 = sphi %s1060_s17, %s1638_s17   ;;  %s1014_s16 = sphi %s1058_s16, %s1637_s16   ;;  %s1010_s15 = sphi %s1056_s15, %s1636_s15  }
   0x4   : > { %p25_p0 = scmp.ge.s32.totalorder %s24_s21, 4  ;;  %p43_p1 = scmp.ne.s32.totalorder %s1014_s16, %s1010_s15 }
   0x5   : > { %p44_p2 = scmp.eq.s32.totalorder %s1026_s19, 0  ;;  %s36_s23 = sadd.s32 1, %s1014_s16 }
   0x6   : > { %s1641_s21 = smov (%p25_p0, %s24_s21), 0  ;;  %p887_p5 = scmp.ge.s32.totalorder %s1026_s19, 4 }
   0x7   : > { %p45_p3 = por %p44_p2, %p43_p1  ;;  %s32_s22 = ssub.s32 %s1022_s18, %s1641_s21 }
   0x8   : > { %p34_p4 = scmp.eq.s32.totalorder %s32_s22, 0  ;;  %167 = sbr.rel (%p887_p5) target bundleno = 25 (0x19), region = 28 }
   0xa   : > { %s1092_s24 = scalar_select %p34_p4, %s1014_s16, %s36_s23  }
   0xd   : > { %170 = sbr.rel (!%p45_p3) target bundleno = 25 (0x19), region = 32  ;;  %s172_s25 = sand.u32 (%p45_p3), 1, %s1014_s16  }
   0xe   : > { %s905_s26 = sshll.u32 (%p45_p3), %s1022_s18, 5  ;;  %s888_s27 = sshll.u32 (%p45_p3), %s172_s25, 6 }
   0xf   : > { %s180_s30 = scalar_lea.vmem (%p45_p3), %s1623_s0, %s905_s26  ;;  %s174_s5 = scalar_lea.vmem (%p45_p3), [#allocation4], %s888_s27 }
  0x10   : > { %v193_v0 = vld [vmem:[%s180_s30] sm:$0xff] (%p45_p3)  ;;  %v195_v1 = vld [vmem:[%s180_s30 + $0x8] sm:$0xff] (%p45_p3)  ;;  %v197_v2 = vld [vmem:[%s180_s30 + $0x10] sm:$0xff] (%p45_p3) }
  0x11   : > { %194 = vst [vmem:[%s174_s5] sm:$0xff] (%p45_p3), %v193_v0  ;;  %v199_v3 = vld [vmem:[%s180_s30 + $0x18] sm:$0xff] (%p45_p3)  ;;  %v201_v4 = vld [vmem:[%s180_s30 + $0x80] sm:$0xff] (%p45_p3)  ;;  %v203_v5 = vld [vmem:[%s180_s30 + $0x88] sm:$0xff] (%p45_p3) }
  0x12   : > { %196 = vst [vmem:[%s174_s5 + $0x8] sm:$0xff] %v195_v1  ;;  %v205_v6 = vld [vmem:[%s180_s30 + $0x90] sm:$0xff]  ;;  %v207_v7 = vld [vmem:[%s180_s30 + $0x98] sm:$0xff] }
  0x13   : > { %198 = vst [vmem:[%s174_s5 + $0x10] sm:$0xff] %v197_v2 }
  0x14   : > { %200 = vst [vmem:[%s174_s5 + $0x18] sm:$0xff] %v199_v3 }
  0x15   : > { %202 = vst [vmem:[%s174_s5 + $0x20] sm:$0xff] %v201_v4 }
  0x16   : > { %204 = vst [vmem:[%s174_s5 + $0x28] sm:$0xff] %v203_v5 }
  0x17   : > { %206 = vst [vmem:[%s174_s5 + $0x30] sm:$0xff] %v205_v6 }
  0x18   : > { %208 = vst [vmem:[%s174_s5 + $0x38] sm:$0xff] %v207_v7 }
  0x19 PF: > { %p891_p6 = scmp.ge.s32.totalorder %s1026_s19, 1  ;;  %p213_p7 = scmp.lt.s32.totalorder %s1026_s19, 5 }
  0x1b   : > { %p214_p8 = pnand %p891_p6, %p213_p7 }
  0x1c   : > { %s220_s6 = sand.u32 (!%p214_p8), 1, %s1010_s15   ;;  %p893_p9 = scmp.ne.s32.totalorder (!%p214_p8), %s1018_s17, 0 }
  0x1d   : > { %217 = sbr.rel (%p214_p8) target bundleno = 441 (0x1b9), region = 55  ;;  %s892_s7 = sshll.u32 (!%p214_p8), %s220_s6, 6 }
  0x1e   : > { %s1103_s8 = scalar_lea.vmem (!%p214_p8), [#allocation4], %s892_s7 }
  0x22   : > { %244 = sbr.rel (%p893_p9) target bundleno = 42 (0x2a), region = 63 }
  0x27   : > { %v1028_v8 = vmov 0.0  }
  0x28   : > { %245 = vst [vmem:[#allocation2] sm:$0xff] %v1028_v8 }
  0x29   : > { %246 = vst [vmem:[#allocation3] sm:$0xff] %v1028_v8 }
  0x2a PF: > { %v1107_v9 = vld [vmem:[%s1103_s8] sm:$0xff]  ;;  %v1110_v10 = vld [vmem:[%s1103_s8 + $0x8] sm:$0xff]  ;;  %v1113_v11 = vld [vmem:[%s1103_s8 + $0x10] sm:$0xff]  ;;  %s894_s9 = sshll.u32 %s1018_s17, 3  ;;  %v256_v12 = vlaneseq  ;;  %vm351_vm12 = vcmask 1041408   ;;  %vm353_vm13 = vcmask 1045508  }
  0x2b   : > { %v1117_v13 = vld [vmem:[%s1103_s8 + $0x18] sm:$0xff]  ;;  %v258_v14 = vstv %s894_s9  ;;  %v289_v15 = vrot.slane %v1107_v9, 4  ;;  %v295_v16 = vrot.slane %v1110_v10, 4  ;;  %v301_v17 = vrot.slane %v1113_v11, 4  ;;  %v1123_v18 = vld [vmem:[%s1103_s8 + $0x20] sm:$0xff]  ;;  %v1131_v30 = vld [vmem:[%s1103_s8 + $0x28] sm:$0xff] }
  0x2c   : > { %v257_v19 = vshrl.u32 %v256_v12, 7  ;;  %v261_v20 = vand.u32 127, %v256_v12  ;;  %v307_v21 = vrot.slane %v1117_v13, 4  ;;  %v313_v25 = vrot.slane %v1123_v18, 4  ;;  %v1137_v43 = vld [vmem:[%s1103_s8 + $0x30] sm:$0xff]  ;;  %v1147_v56 = vld [vmem:[%s1103_s8 + $0x38] sm:$0xff] }
  0x2d   : > { %v290_v22 = vadd.f32 %v289_v15, %v1107_v9  ;;  %v296_v23 = vadd.f32 %v295_v16, %v1110_v10  ;;  %v302_v24 = vadd.f32 %v301_v17, %v1113_v11  ;;  %v319_v38 = vrot.slane %v1131_v30, 4  ;;  %p899_p10 = scmp.ne.s32.totalorder %s1018_s17, 3 }
  0x2e   : > { %v259_v26 = vadd.s32 %v258_v14, %v257_v19  ;;  %v262_v27 = vadd.s32 128, %v261_v20  ;;  %v263_v28 = vadd.s32 256, %v261_v20  ;;  %v264_v29 = vadd.s32 384, %v261_v20 }
  0x2f   : > { %v291_v31 = vrot.slane %v290_v22, 2  ;;  %v297_v32 = vrot.slane %v296_v23, 2  ;;  %v303_v33 = vrot.slane %v302_v24, 2  ;;  %v308_v34 = vadd.f32 %v307_v21, %v1117_v13 }
  0x30   : > { %v265_v35 = vmul.u32 16, %v259_v26  ;;  %v270_v36 = vadd.s32 1, %v259_v26  ;;  %v314_v37 = vadd.f32 %v313_v25, %v1123_v18  ;;  %v320_v49 = vadd.f32 %v319_v38, %v1131_v30 }
  0x31   : > { %v292_v39 = vadd.f32 %v291_v31, %v290_v22  ;;  %v298_v40 = vadd.f32 %v297_v32, %v296_v23  ;;  %v304_v41 = vadd.f32 %v303_v33, %v302_v24  ;;  %v309_v42 = vrot.slane %v308_v34, 2 }
  0x32   : > { %vm266_vm0 = vcmp.ge.s32.totalorder %v261_v20, %v265_v35  ;;  %vm267_vm1 = vcmp.ge.s32.totalorder %v262_v27, %v265_v35  ;;  %vm268_vm2 = vcmp.ge.s32.totalorder %v263_v28, %v265_v35  ;;  %vm269_vm3 = vcmp.ge.s32.totalorder %v264_v29, %v265_v35 }
  0x33   : > { %v271_v44 = vmul.u32 16, %v270_v36  ;;  %v299_v45 = vrot.slane %v298_v40, 1  ;;  %v305_v46 = vrot.slane %v304_v41, 1  ;;  %v310_v47 = vadd.f32 %v309_v42, %v308_v34 }
  0x34   : > { %v315_v48 = vrot.slane %v314_v37, 2  ;;  %v325_v50 = vrot.slane %v1137_v43, 4  ;;  %v293_v51 = vrot.slane %v292_v39, 1  ;;  %v321_v59 = vrot.slane %v320_v49, 2 }
  0x35   : > { %vm272_vm4 = vcmp.lt.s32.totalorder %v261_v20, %v271_v44  ;;  %vm273_vm5 = vcmp.lt.s32.totalorder %v262_v27, %v271_v44  ;;  %vm274_vm6 = vcmp.lt.s32.totalorder %v263_v28, %v271_v44  ;;  %vm275_vm7 = vcmp.lt.s32.totalorder %v264_v29, %v271_v44 }
  0x36   : > { %vm1142_vm8 = vmand %vm266_vm0, %vm272_vm4  ;;  %v300_v53 = vadd.f32 %v299_v45, %v298_v40  ;;  %v306_v54 = vadd.f32 %v305_v46, %v304_v41  ;;  %v311_v55 = vrot.slane %v310_v47, 1  ;;  %v316_v58 = vadd.f32 %v315_v48, %v314_v37 }
  0x37   : > { %vm1150_vm9 = vmand %vm267_vm1, %vm273_vm5  ;;  %v326_v60 = vadd.f32 %v325_v50, %v1137_v43  ;;  %v331_v63 = vrot.slane %v1147_v56, 4  ;;  %v294_v1 = vadd.f32 %v293_v51, %v292_v39  ;;  %v322_v3 = vadd.f32 %v321_v59, %v320_v49 }
  0x38   : > { %vm1156_vm10 = vmand %vm268_vm2, %vm274_vm6  ;;  %v312_v62 = vadd.f32 %v311_v55, %v310_v47  ;;  %v317_v2 = vrot.slane %v316_v58, 1  ;;  %v345_v6 = vrot.slane %v300_v53, 6  ;;  %v346_v7 = vrot.slane %v306_v54, 4 }
  0x39   : > { %vm1162_vm11 = vmand %vm269_vm3, %vm275_vm7  ;;  %v327_v4 = vrot.slane %v326_v60, 2  ;;  %v332_v5 = vadd.f32 %v331_v63, %v1147_v56  ;;  %v1029_v12 = vmov 0.0   ;;  %v323_v15 = vrot.slane %v322_v3, 1 }
  0x3a   : > { %v347_v8 = vrot.slane %v312_v62, 2  ;;  %v895_v14 = vsel %vm1142_vm8, 1.0, %v1029_v12  ;;  %v896_v17 = vsel %vm1150_vm9, 1.0, %v1029_v12  ;;  %v897_v19 = vsel %vm1156_vm10, 1.0, %v1029_v12 }
  0x3b   : > { %v328_v16 = vadd.f32 %v327_v4, %v326_v60  ;;  %v898_v20 = vsel %vm1162_vm11, 1.0, %v1029_v12  ;;  %v333_v21 = vrot.slane %v332_v5, 2  ;;  %v318_v22 = vadd.f32 %v317_v2, %v316_v58 }
  0x3c   : > { %v324_v23 = vadd.f32 %v323_v15, %v322_v3  ;;  %v352_v26 = vsel %vm351_vm12, %v294_v1, %v345_v6  ;;  %v354_v27 = vsel %vm353_vm13, %v346_v7, %v347_v8  ;;  %vm355_vm14 = vcmask 1043456  }
  0x3d   : > { %v329_v24 = vrot.slane %v328_v16, 1  ;;  %v334_v25 = vadd.f32 %v333_v21, %v332_v5  ;;  %vm365_vm15 = vcmask 1041409   ;;  %v377_v31 = vmul.f32 %v895_v14, %v1107_v9  ;;  %v288_v5 = vld [vmem:[#allocation3] sm:$0xff] }
  0x3e   : > { %v348_v29 = vrot.slane %v324_v23, 6  ;;  %v378_v32 = vmul.f32 %v896_v17, %v1110_v10  ;;  %v379_v34 = vmul.f32 %v897_v19, %v1113_v11  ;;  %v380_v35 = vmul.f32 %v898_v20, %v1117_v13 }
  0x3f   : > { %v330_v28 = vadd.f32 %v329_v24, %v328_v16  ;;  %v335_v33 = vrot.slane %v334_v25, 1  ;;  %v381_v36 = vmul.f32 %v895_v14, %v1123_v18  ;;  %vm367_vm0 = vcmask 1043459  }
  0x40   : > { %v382_v38 = vmul.f32 %v896_v17, %v1131_v30  ;;  %v383_v39 = vmul.f32 %v897_v19, %v1137_v43  ;;  %v357_v41 = vsel %vm351_vm12, %v318_v22, %v348_v29  ;;  %v385_v42 = vrot.slane %v377_v31, 4 }
  0x41   : > { %v349_v37 = vrot.slane %v330_v28, 4  ;;  %v336_v40 = vadd.f32 %v335_v33, %v334_v25  ;;  %v391_v9 = vrot.slane %v378_v32, 4  ;;  %v397_v44 = vrot.slane %v379_v34, 4 }
  0x42   : > { %v403_v10 = vrot.slane %v380_v35, 4  ;;  %v409_v45 = vrot.slane %v381_v36, 4  ;;  %v415_v46 = vrot.slane %v382_v38, 4  ;;  %v386_v47 = vadd.f32 %v385_v42, %v377_v31 }
  0x43   : > { %v350_v11 = vrot.slane %v336_v40, 2  ;;  %v392_v13 = vadd.f32 %v391_v9, %v378_v32  ;;  %v421_v48 = vrot.slane %v383_v39, 4  ;;  %v398_v18 = vadd.f32 %v397_v44, %v379_v34 }
  0x44   : > { %v404_v49 = vadd.f32 %v403_v10, %v380_v35  ;;  %v410_v50 = vadd.f32 %v409_v45, %v381_v36  ;;  %v416_v51 = vadd.f32 %v415_v46, %v382_v38  ;;  %v356_v30 = vsel %vm355_vm14, %v352_v26, %v354_v27 }
  0x45   : > { %v358_v43 = vsel %vm353_vm13, %v349_v37, %v350_v11  ;;  %v393_v52 = vrot.slane %v392_v13, 2  ;;  %v422_v53 = vadd.f32 %v421_v48, %v383_v39  ;;  %vm369_vm1 = vcmask 1045509  }
  0x46   : > { %v359_v54 = vsel %vm355_vm14, %v357_v41, %v358_v43  ;;  %v399_v55 = vrot.slane %v398_v18, 2  ;;  %v405_v57 = vrot.slane %v404_v49, 2  ;;  %v387_v59 = vrot.slane %v386_v47, 2 }
  0x47   : > { %v364_v58 = vrot.slane %v359_v54, 7  ;;  %v411_v60 = vrot.slane %v410_v50, 2  ;;  %v417_v61 = vrot.slane %v416_v51, 2  ;;  %vm371_vm2 = vcmask 1047559  }
  0x48   : > { %v394_v62 = vadd.f32 %v393_v52, %v392_v13  ;;  %v400_v63 = vadd.f32 %v399_v55, %v398_v18  ;;  %v406_v0 = vadd.f32 %v405_v57, %v404_v49  ;;  %v384_v2 = vmul.f32 %v898_v20, %v1147_v56  ;;  %v376_v18 = vld [vmem:[#allocation2] sm:$0xff] }
  0x49   : > { %v366_v1 = vsel %vm365_vm15, %v364_v58, %v356_v30  ;;  %v418_v3 = vadd.f32 %v417_v61, %v416_v51  ;;  %v423_v4 = vrot.slane %v422_v53, 2  ;;  %v388_v8 = vadd.f32 %v387_v59, %v386_v47 }
  0x4a   : > { %v368_v6 = vsel %vm367_vm0, %v364_v58, %v366_v1  ;;  %v412_v12 = vadd.f32 %v411_v60, %v410_v50  ;;  %v395_v15 = vrot.slane %v394_v62, 1  ;;  %v401_v16 = vrot.slane %v400_v63, 1 }
  0x4b   : > { %v370_v7 = vsel %vm369_vm1, %v364_v58, %v368_v6  ;;  %v407_v17 = vrot.slane %v406_v0, 1  ;;  %v419_v21 = vrot.slane %v418_v3, 1  ;;  %v424_v22 = vadd.f32 %v423_v4, %v422_v53 }
  0x4c   : > { %v372_v14 = vsel %vm371_vm2, %v364_v58, %v370_v7  ;;  %v427_v23 = vrot.slane %v384_v2, 4  ;;  %v389_v24 = vrot.slane %v388_v8, 1  ;;  %v396_v25 = vadd.f32 %v395_v15, %v394_v62 }
  0x4d   : > { %v374_v19 = vadd.f32 %v372_v14, %v288_v5  ;;  %v425_v56 = vrot.slane %v424_v22, 1  ;;  %v413_v26 = vrot.slane %v412_v12, 1  ;;  %v402_v27 = vadd.f32 %v401_v16, %v400_v63 }
  0x4e   : > { %v428_v20 = vadd.f32 %v427_v23, %v384_v2  ;;  %v408_v28 = vadd.f32 %v407_v17, %v406_v0  ;;  %v420_v29 = vadd.f32 %v419_v21, %v418_v3  ;;  %v390_v34 = vadd.f32 %v389_v24, %v388_v8 }
  0x4f   : > { %375 = vst [vmem:[#allocation3] sm:$0xff] %v374_v19  ;;  %v426_v32 = vadd.f32 %v425_v56, %v424_v22  ;;  %v414_v35 = vadd.f32 %v413_v26, %v412_v12  ;;  %v441_v36 = vrot.slane %v396_v25, 6  ;;  %v442_v38 = vrot.slane %v402_v27, 4 }
  0x50   : > { %v429_v31 = vrot.slane %v428_v20, 2  ;;  %v443_v39 = vrot.slane %v408_v28, 2  ;;  %v444_v40 = vrot.slane %v420_v29, 6 }
  0x51   : > { %v445_v42 = vrot.slane %v426_v32, 4  ;;  %v447_v44 = vsel %vm351_vm12, %v390_v34, %v441_v36 }
  0x52   : > { %v430_v33 = vadd.f32 %v429_v31, %v428_v20  ;;  %v448_v10 = vsel %vm353_vm13, %v442_v38, %v443_v39  ;;  %v450_v45 = vsel %vm351_vm12, %v414_v35, %v444_v40 }
  0x53   : > { %v449_v11 = vsel %vm355_vm14, %v447_v44, %v448_v10 }
  0x54   : > { %v431_v37 = vrot.slane %v430_v33, 1 }
  0x56   : > { %v432_v41 = vadd.f32 %v431_v37, %v430_v33 }
  0x58   : > { %v446_v9 = vrot.slane %v432_v41, 2 }
  0x5a   : > { %v451_v46 = vsel %vm353_vm13, %v445_v42, %v446_v9 }
  0x5b   : > { %v452_v47 = vsel %vm355_vm14, %v450_v45, %v451_v46 }
  0x5c   : > { %v455_v13 = vrot.slane %v452_v47, 7 }
  0x5e   : > { %v456_v48 = vsel %vm365_vm15, %v455_v13, %v449_v11 }
  0x5f   : > { %v457_v49 = vsel %vm367_vm0, %v455_v13, %v456_v48 }
  0x60   : > { %v458_v50 = vsel %vm369_vm1, %v455_v13, %v457_v49  ;;  %466 = sbr.rel (%p899_p10) target bundleno = 435 (0x1b3), region = 67 }
  0x61   : > { %v459_v51 = vsel %vm371_vm2, %v455_v13, %v458_v50 }
  0x62   : > { %v461_v30 = vadd.f32 %v459_v51, %v376_v18 }
  0x64   : > { %462 = vst [vmem:[#allocation2] sm:$0xff] %v461_v30 }
  0x65   : > { %v536_v43 = vld [vmem:[%s1624_s1 + $0x178] sm:$0xff]  ;;  %v535_v53 = vld [vmem:[%s1624_s1 + $0x170] sm:$0xff]  ;;  %v534_v58 = vld [vmem:[%s1624_s1 + $0x168] sm:$0xff]  ;;  %vm788_vm4 = vcmask 261120   ;;  %vm813_vm5 = vcmask 254976  }
  0x66   : > { %v504_v52 = vld [vmem:[%s1624_s1 + $0x78] sm:$0xff]  ;;  %661 = vmatpush.msra.mxu2 %v536_v43  ;;  %v503_v55 = vld [vmem:[%s1624_s1 + $0x70] sm:$0xff]  ;;  %v502_v60 = vld [vmem:[%s1624_s1 + $0x68] sm:$0xff] }
  0x67   : > { %621 = vmatpush.msra.mxu0 %v504_v52  ;;  %v552_v54 = vld [vmem:[%s1624_s1 + $0x1f8] sm:$0xff]  ;;  %v551_v59 = vld [vmem:[%s1624_s1 + $0x1f0] sm:$0xff]  ;;  %v550_v62 = vld [vmem:[%s1624_s1 + $0x1e8] sm:$0xff] }
  0x68   : > { %v520_v57 = vld [vmem:[%s1624_s1 + $0xf8] sm:$0xff]  ;;  %681 = vmatpush.msra.mxu3 %v552_v54  ;;  %662 = vmatpush.msra.mxu2 %v535_v53  ;;  %v519_v61 = vld [vmem:[%s1624_s1 + $0xf0] sm:$0xff]  ;;  %v533_v63 = vld [vmem:[%s1624_s1 + $0x160] sm:$0xff] }
  0x69   : > { %641 = vmatpush.msra.mxu1 %v520_v57  ;;  %622 = vmatpush.msra.mxu0 %v503_v55  ;;  %v501_v0 = vld [vmem:[%s1624_s1 + $0x60] sm:$0xff]  ;;  %v518_v1 = vld [vmem:[%s1624_s1 + $0xe8] sm:$0xff]  ;;  %v532_v4 = vld [vmem:[%s1624_s1 + $0x158] sm:$0xff] }
  0x6a   : > { %682 = vmatpush.msra.mxu3 %v551_v59  ;;  %663 = vmatpush.msra.mxu2 %v534_v58  ;;  %v549_v2 = vld [vmem:[%s1624_s1 + $0x1e0] sm:$0xff]  ;;  %v500_v5 = vld [vmem:[%s1624_s1 + $0x58] sm:$0xff]  ;;  %v531_v8 = vld [vmem:[%s1624_s1 + $0x150] sm:$0xff] }
  0x6b   : > { %642 = vmatpush.msra.mxu1 %v519_v61  ;;  %623 = vmatpush.msra.mxu0 %v502_v60  ;;  %v517_v3 = vld [vmem:[%s1624_s1 + $0xe0] sm:$0xff]  ;;  %v548_v6 = vld [vmem:[%s1624_s1 + $0x1d8] sm:$0xff]  ;;  %v499_v12 = vld [vmem:[%s1624_s1 + $0x50] sm:$0xff] }
  0x6c   : > { %683 = vmatpush.msra.mxu3 %v550_v62  ;;  %664 = vmatpush.msra.mxu2 %v533_v63  ;;  %v516_v7 = vld [vmem:[%s1624_s1 + $0xd8] sm:$0xff]  ;;  %v547_v14 = vld [vmem:[%s1624_s1 + $0x1d0] sm:$0xff]  ;;  %v530_v16 = vld [vmem:[%s1624_s1 + $0x148] sm:$0xff] }
  0x6d   : > { %643 = vmatpush.msra.mxu1 %v518_v1  ;;  %624 = vmatpush.msra.mxu0 %v501_v0  ;;  %v515_v15 = vld [vmem:[%s1624_s1 + $0xd0] sm:$0xff]  ;;  %v498_v17 = vld [vmem:[%s1624_s1 + $0x48] sm:$0xff]  ;;  %v529_v22 = vld [vmem:[%s1624_s1 + $0x140] sm:$0xff] }
  0x6e   : > { %684 = vmatpush.msra.mxu3 %v549_v2  ;;  %665 = vmatpush.msra.mxu2 %v532_v4  ;;  %v546_v19 = vld [vmem:[%s1624_s1 + $0x1c8] sm:$0xff]  ;;  %v497_v23 = vld [vmem:[%s1624_s1 + $0x40] sm:$0xff]  ;;  %v528_v24 = vld [vmem:[%s1624_s1 + $0x138] sm:$0xff] }
  0x6f   : > { %644 = vmatpush.msra.mxu1 %v517_v3  ;;  %625 = vmatpush.msra.mxu0 %v500_v5  ;;  %v514_v21 = vld [vmem:[%s1624_s1 + $0xc8] sm:$0xff]  ;;  %v545_v56 = vld [vmem:[%s1624_s1 + $0x1c0] sm:$0xff]  ;;  %v496_v25 = vld [vmem:[%s1624_s1 + $0x38] sm:$0xff] }
  0x70   : > { %685 = vmatpush.msra.mxu3 %v548_v6  ;;  %666 = vmatpush.msra.mxu2 %v531_v8  ;;  %v513_v20 = vld [vmem:[%s1624_s1 + $0xc0] sm:$0xff]  ;;  %v544_v26 = vld [vmem:[%s1624_s1 + $0x1b8] sm:$0xff]  ;;  %v527_v28 = vld [vmem:[%s1624_s1 + $0x130] sm:$0xff] }
  0x71   : > { %645 = vmatpush.msra.mxu1 %v516_v7  ;;  %626 = vmatpush.msra.mxu0 %v499_v12  ;;  %v512_v27 = vld [vmem:[%s1624_s1 + $0xb8] sm:$0xff]  ;;  %v495_v29 = vld [vmem:[%s1624_s1 + $0x30] sm:$0xff]  ;;  %v526_v33 = vld [vmem:[%s1624_s1 + $0x128] sm:$0xff] }
  0x72   : > { %686 = vmatpush.msra.mxu3 %v547_v14  ;;  %667 = vmatpush.msra.mxu2 %v530_v16  ;;  %v543_v31 = vld [vmem:[%s1624_s1 + $0x1b0] sm:$0xff]  ;;  %v494_v34 = vld [vmem:[%s1624_s1 + $0x28] sm:$0xff]  ;;  %v525_v37 = vld [vmem:[%s1624_s1 + $0x120] sm:$0xff] }
  0x73   : > { %646 = vmatpush.msra.mxu1 %v515_v15  ;;  %627 = vmatpush.msra.mxu0 %v498_v17  ;;  %v511_v32 = vld [vmem:[%s1624_s1 + $0xb0] sm:$0xff]  ;;  %v542_v35 = vld [vmem:[%s1624_s1 + $0x1a8] sm:$0xff]  ;;  %v493_v38 = vld [vmem:[%s1624_s1 + $0x20] sm:$0xff] }
  0x74   : > { %687 = vmatpush.msra.mxu3 %v546_v19  ;;  %668 = vmatpush.msra.mxu2 %v529_v22  ;;  %v510_v36 = vld [vmem:[%s1624_s1 + $0xa8] sm:$0xff]  ;;  %v541_v39 = vld [vmem:[%s1624_s1 + $0x1a0] sm:$0xff]  ;;  %v524_v41 = vld [vmem:[%s1624_s1 + $0x118] sm:$0xff] }
  0x75   : > { %647 = vmatpush.msra.mxu1 %v514_v21  ;;  %628 = vmatpush.msra.mxu0 %v497_v23  ;;  %v509_v40 = vld [vmem:[%s1624_s1 + $0xa0] sm:$0xff]  ;;  %v492_v42 = vld [vmem:[%s1624_s1 + $0x18] sm:$0xff]  ;;  %v523_v10 = vld [vmem:[%s1624_s1 + $0x110] sm:$0xff] }
  0x76   : > { %688 = vmatpush.msra.mxu3 %v545_v56  ;;  %669 = vmatpush.msra.mxu2 %v528_v24  ;;  %v540_v9 = vld [vmem:[%s1624_s1 + $0x198] sm:$0xff]  ;;  %v491_v45 = vld [vmem:[%s1624_s1 + $0x10] sm:$0xff]  ;;  %v522_v47 = vld [vmem:[%s1624_s1 + $0x108] sm:$0xff] }
  0x77   : > { %648 = vmatpush.msra.mxu1 %v513_v20  ;;  %629 = vmatpush.msra.mxu0 %v496_v25  ;;  %v508_v44 = vld [vmem:[%s1624_s1 + $0x98] sm:$0xff]  ;;  %v539_v46 = vld [vmem:[%s1624_s1 + $0x190] sm:$0xff]  ;;  %v490_v13 = vld [vmem:[%s1624_s1 + $0x8] sm:$0xff] }
  0x78   : > { %689 = vmatpush.msra.mxu3 %v544_v26  ;;  %670 = vmatpush.msra.mxu2 %v527_v28  ;;  %v507_v11 = vld [vmem:[%s1624_s1 + $0x90] sm:$0xff]  ;;  %v538_v48 = vld [vmem:[%s1624_s1 + $0x188] sm:$0xff]  ;;  %v521_v49 = vld [vmem:[%s1624_s1 + $0x100] sm:$0xff] }
  0x79   : > { %649 = vmatpush.msra.mxu1 %v512_v27  ;;  %630 = vmatpush.msra.mxu0 %v495_v29  ;;  %v506_v18 = vld [vmem:[%s1624_s1 + $0x88] sm:$0xff]  ;;  %v489_v50 = vld [vmem:[%s1624_s1] sm:$0xff]  ;;  %v600_v51 = vld [vmem:[%s1624_s1 + $0x378] sm:$0xff] }
  0x7a   : > { %690 = vmatpush.msra.mxu3 %v543_v31  ;;  %671 = vmatpush.msra.mxu2 %v526_v33  ;;  %v537_v30 = vld [vmem:[%s1624_s1 + $0x180] sm:$0xff]  ;;  %v568_v43 = vld [vmem:[%s1624_s1 + $0x278] sm:$0xff]  ;;  %v599_v53 = vld [vmem:[%s1624_s1 + $0x370] sm:$0xff] }
  0x7b   : > { %650 = vmatpush.msra.mxu1 %v511_v32  ;;  %631 = vmatpush.msra.mxu0 %v494_v34  ;;  %v616_v52 = vld [vmem:[%s1624_s1 + $0x3f8] sm:$0xff]  ;;  %v505_v54 = vld [vmem:[%s1624_s1 + $0x80] sm:$0xff]  ;;  %v567_v55 = vld [vmem:[%s1624_s1 + $0x270] sm:$0xff] }
  0x7c   : > { %691 = vmatpush.msra.mxu3 %v542_v35  ;;  %672 = vmatpush.msra.mxu2 %v525_v37  ;;  %v584_v57 = vld [vmem:[%s1624_s1 + $0x2f8] sm:$0xff]  ;;  %v598_v58 = vld [vmem:[%s1624_s1 + $0x368] sm:$0xff]  ;;  %v615_v59 = vld [vmem:[%s1624_s1 + $0x3f0] sm:$0xff] }
  0x7d   : > { %651 = vmatpush.msra.mxu1 %v510_v36  ;;  %632 = vmatpush.msra.mxu0 %v493_v38  ;;  %v566_v60 = vld [vmem:[%s1624_s1 + $0x268] sm:$0xff]  ;;  %v583_v61 = vld [vmem:[%s1624_s1 + $0x2f0] sm:$0xff]  ;;  %v597_v62 = vld [vmem:[%s1624_s1 + $0x360] sm:$0xff] }
  0x7e   : > { %692 = vmatpush.msra.mxu3 %v541_v39  ;;  %673 = vmatpush.msra.mxu2 %v524_v41  ;;  %v614_v63 = vld [vmem:[%s1624_s1 + $0x3e8] sm:$0xff]  ;;  %v565_v0 = vld [vmem:[%s1624_s1 + $0x260] sm:$0xff]  ;;  %v596_v3 = vld [vmem:[%s1624_s1 + $0x358] sm:$0xff] }
  0x7f   : > { %652 = vmatpush.msra.mxu1 %v509_v40  ;;  %633 = vmatpush.msra.mxu0 %v492_v42  ;;  %v582_v1 = vld [vmem:[%s1624_s1 + $0x2e8] sm:$0xff]  ;;  %v613_v4 = vld [vmem:[%s1624_s1 + $0x3e0] sm:$0xff]  ;;  %v564_v5 = vld [vmem:[%s1624_s1 + $0x258] sm:$0xff] }
  0x80   : > { %693 = vmatpush.msra.mxu3 %v540_v9  ;;  %674 = vmatpush.msra.mxu2 %v523_v10  ;;  %v467_v2 = vld [vmem:[#allocation2] sm:$0xff]  ;;  %v581_v6 = vld [vmem:[%s1624_s1 + $0x2e0] sm:$0xff]  ;;  %v595_v7 = vld [vmem:[%s1624_s1 + $0x350] sm:$0xff] }
  0x81   : > { %653 = vmatpush.msra.mxu1 %v508_v44  ;;  %634 = vmatpush.msra.mxu0 %v491_v45  ;;  %470 = vst [vmem:[#allocation1] ss:$4 sm:$0xff] %v467_v2  ;;  %v612_v8 = vld [vmem:[%s1624_s1 + $0x3d8] sm:$0xff]  ;;  %v563_v12 = vld [vmem:[%s1624_s1 + $0x250] sm:$0xff]  ;;  %v594_v15 = vld [vmem:[%s1624_s1 + $0x348] sm:$0xff] }
  0x82   : > { %694 = vmatpush.msra.mxu3 %v539_v46  ;;  %675 = vmatpush.msra.mxu2 %v522_v47  ;;  %v580_v14 = vld [vmem:[%s1624_s1 + $0x2d8] sm:$0xff]  ;;  %v611_v16 = vld [vmem:[%s1624_s1 + $0x3d0] sm:$0xff]  ;;  %v562_v17 = vld [vmem:[%s1624_s1 + $0x248] sm:$0xff] }
  0x83   : > { %654 = vmatpush.msra.mxu1 %v507_v11  ;;  %635 = vmatpush.msra.mxu0 %v490_v13  ;;  %v579_v19 = vld [vmem:[%s1624_s1 + $0x2d0] sm:$0xff]  ;;  %v593_v21 = vld [vmem:[%s1624_s1 + $0x340] sm:$0xff]  ;;  %v610_v22 = vld [vmem:[%s1624_s1 + $0x3c8] sm:$0xff] }
  0x84   : > { %695 = vmatpush.msra.mxu3 %v538_v48  ;;  %676 = vmatpush.msra.mxu2 %v521_v49  ;;  %v561_v23 = vld [vmem:[%s1624_s1 + $0x240] sm:$0xff]  ;;  %v578_v56 = vld [vmem:[%s1624_s1 + $0x2c8] sm:$0xff]  ;;  %v592_v20 = vld [vmem:[%s1624_s1 + $0x338] sm:$0xff] }
  0x85   : > { %655 = vmatpush.msra.mxu1 %v506_v18  ;;  %636 = vmatpush.msra.mxu0 %v489_v50  ;;  %v609_v24 = vld [vmem:[%s1624_s1 + $0x3c0] sm:$0xff]  ;;  %v468_v25 = vld [vmem:[#allocation3] sm:$0xff]  ;;  %v560_v31 = vld [vmem:[%s1624_s1 + $0x238] sm:$0xff] }
  0x86   : > { %741 = vmatpush.msrb.mxu2 %v600_v51  ;;  %696 = vmatpush.msra.mxu3 %v537_v30  ;;  %v577_v32 = vld [vmem:[%s1624_s1 + $0x2c0] sm:$0xff]  ;;  %v591_v33 = vld [vmem:[%s1624_s1 + $0x330] sm:$0xff]  ;;  %v608_v34 = vld [vmem:[%s1624_s1 + $0x3b8] sm:$0xff] }
  0x87   : > { %701 = vmatpush.msrb.mxu0 %v568_v43  ;;  %656 = vmatpush.msra.mxu1 %v505_v54  ;;  %v559_v35 = vld [vmem:[%s1624_s1 + $0x230] sm:$0xff]  ;;  %v576_v36 = vld [vmem:[%s1624_s1 + $0x2b8] sm:$0xff]  ;;  %v590_v37 = vld [vmem:[%s1624_s1 + $0x328] sm:$0xff] }
  0x88   : > { %761 = vmatpush.msrb.mxu3 %v616_v52  ;;  %742 = vmatpush.msrb.mxu2 %v599_v53  ;;  %v473_v26 = vld.sshfl [vmem:[#allocation1 + $0x10] sm:$0xff pattern:$0x73625140]  ;;  %v471_v27 = vld.sshfl [vmem:[#allocation1] sm:$0xff pattern:$0x73625140] }
  0x89   : > { %702 = vmatpush.msrb.mxu0 %v567_v55  ;;  %721 = vmatpush.msrb.mxu1 %v584_v57  ;;  %v474_v28 = vld.sshfl [vmem:[#allocation1 + $0x18] sm:$0xff pattern:$0x73625140]  ;;  %v472_v29 = vld.sshfl [vmem:[#allocation1 + $0x8] sm:$0xff pattern:$0x73625140] }
  0x8a   : > { %743 = vmatpush.msrb.mxu2 %v598_v58  ;;  %762 = vmatpush.msrb.mxu3 %v615_v59  ;;  %480 = vst [vmem:[#allocation1] ss:$4 sm:$0xff] %v468_v25  ;;  %v607_v38 = vld [vmem:[%s1624_s1 + $0x3b0] sm:$0xff]  ;;  %v558_v39 = vld [vmem:[%s1624_s1 + $0x228] sm:$0xff]  ;;  %v589_v41 = vld [vmem:[%s1624_s1 + $0x320] sm:$0xff] }
  0x8b   : > { %703 = vmatpush.msrb.mxu0 %v566_v60  ;;  %722 = vmatpush.msrb.mxu1 %v583_v61  ;;  %v575_v40 = vld [vmem:[%s1624_s1 + $0x2b0] sm:$0xff]  ;;  %v606_v42 = vld [vmem:[%s1624_s1 + $0x3a8] sm:$0xff]  ;;  %v557_v9 = vld [vmem:[%s1624_s1 + $0x220] sm:$0xff] }
  0x8c   : > { %744 = vmatpush.msrb.mxu2 %v597_v62  ;;  %763 = vmatpush.msrb.mxu3 %v614_v63  ;;  %v574_v44 = vld [vmem:[%s1624_s1 + $0x2a8] sm:$0xff]  ;;  %v588_v10 = vld [vmem:[%s1624_s1 + $0x318] sm:$0xff]  ;;  %v605_v45 = vld [vmem:[%s1624_s1 + $0x3a0] sm:$0xff] }
  0x8d   : > { %704 = vmatpush.msrb.mxu0 %v565_v0  ;;  %723 = vmatpush.msrb.mxu1 %v582_v1  ;;  %v556_v46 = vld [vmem:[%s1624_s1 + $0x218] sm:$0xff]  ;;  %v573_v11 = vld [vmem:[%s1624_s1 + $0x2a0] sm:$0xff]  ;;  %v587_v47 = vld [vmem:[%s1624_s1 + $0x310] sm:$0xff] }
  0x8e   : > { %745 = vmatpush.msrb.mxu2 %v596_v3  ;;  %764 = vmatpush.msrb.mxu3 %v613_v4  ;;  %v604_v13 = vld [vmem:[%s1624_s1 + $0x398] sm:$0xff]  ;;  %v555_v48 = vld [vmem:[%s1624_s1 + $0x210] sm:$0xff]  ;;  %v586_v49 = vld [vmem:[%s1624_s1 + $0x308] sm:$0xff] }
  0x8f   : > { %705 = vmatpush.msrb.mxu0 %v564_v5  ;;  %724 = vmatpush.msrb.mxu1 %v581_v6  ;;  %v572_v18 = vld [vmem:[%s1624_s1 + $0x298] sm:$0xff]  ;;  %v603_v50 = vld [vmem:[%s1624_s1 + $0x390] sm:$0xff]  ;;  %v554_v51 = vld [vmem:[%s1624_s1 + $0x208] sm:$0xff] }
  0x90   : > { %746 = vmatpush.msrb.mxu2 %v595_v7  ;;  %765 = vmatpush.msrb.mxu3 %v612_v8  ;;  %v571_v30 = vld [vmem:[%s1624_s1 + $0x290] sm:$0xff]  ;;  %v585_v43 = vld [vmem:[%s1624_s1 + $0x300] sm:$0xff]  ;;  %v602_v52 = vld [vmem:[%s1624_s1 + $0x388] sm:$0xff] }
  0x91   : > { %706 = vmatpush.msrb.mxu0 %v563_v12  ;;  %725 = vmatpush.msrb.mxu1 %v580_v14  ;;  %v483_v53 = vld.sshfl [vmem:[#allocation1 + $0x10] sm:$0xff pattern:$0x73625140]  ;;  %v553_v54 = vld [vmem:[%s1624_s1 + $0x200] sm:$0xff]  ;;  %v570_v55 = vld [vmem:[%s1624_s1 + $0x288] sm:$0xff] }
  0x92   : > { %747 = vmatpush.msrb.mxu2 %v594_v15  ;;  %766 = vmatpush.msrb.mxu3 %v611_v16  ;;  %v601_v57 = vld [vmem:[%s1624_s1 + $0x380] sm:$0xff]  ;;  %v484_v59 = vld.sshfl [vmem:[#allocation1 + $0x18] sm:$0xff pattern:$0x73625140]  ;;  %v786_v63 = vld [vmem:[%s1626_s3 + $0x10] sm:$0xff] }
  0x93   : > { %707 = vmatpush.msrb.mxu0 %v562_v17  ;;  %726 = vmatpush.msrb.mxu1 %v579_v19  ;;  %v481_v58 = vld.sshfl [vmem:[#allocation1] sm:$0xff pattern:$0x73625140]  ;;  %v482_v61 = vld.sshfl [vmem:[#allocation1 + $0x8] sm:$0xff pattern:$0x73625140] }
  0x94   : > { %748 = vmatpush.msrb.mxu2 %v593_v21  ;;  %767 = vmatpush.msrb.mxu3 %v610_v22  ;;  %v569_v60 = vld [vmem:[%s1624_s1 + $0x280] sm:$0xff]  ;;  %v787_v62 = vld [vmem:[%s1626_s3 + $0x18] sm:$0xff]  ;;  %v785_v0 = vld [vmem:[%s1626_s3 + $0x8] sm:$0xff] }
  0x95   : > { %708 = vmatpush.msrb.mxu0 %v561_v23  ;;  %727 = vmatpush.msrb.mxu1 %v578_v56  ;;  %v784_v1 = vld [vmem:[%s1626_s3] sm:$0xff] }
  0x96   : > { %749 = vmatpush.msrb.mxu2 %v592_v20  ;;  %768 = vmatpush.msrb.mxu3 %v609_v24  ;;  %v955_v2 = vld [vmem:[%s1625_s2] ss:$0 sm:$0xff] }
  0x97   : > { %709 = vmatpush.msrb.mxu0 %v560_v31  ;;  %728 = vmatpush.msrb.mxu1 %v577_v32 }
  0x98   : > { %750 = vmatpush.msrb.mxu2 %v591_v33  ;;  %769 = vmatpush.msrb.mxu3 %v608_v34 }
  0x99   : > { %710 = vmatpush.msrb.mxu0 %v559_v35  ;;  %729 = vmatpush.msrb.mxu1 %v576_v36 }
  0x9a   : > { %751 = vmatpush.msrb.mxu2 %v590_v37  ;;  %770 = vmatpush.msrb.mxu3 %v607_v38 }
  0x9b   : > { %711 = vmatpush.msrb.mxu0 %v558_v39  ;;  %730 = vmatpush.msrb.mxu1 %v575_v40 }
  0x9c   : > { %752 = vmatpush.msrb.mxu2 %v589_v41  ;;  %771 = vmatpush.msrb.mxu3 %v606_v42 }
  0x9d   : > { %677 = vmatmul.f32.vlgmr.msra.gmra.mxu2 %v473_v26  ;;  %712 = vmatpush.msrb.mxu0 %v557_v9 }
  0x9e   : > { %731 = vmatpush.msrb.mxu1 %v574_v44  ;;  %753 = vmatpush.msrb.mxu2 %v588_v10 }
  0x9f   : > { %772 = vmatpush.msrb.mxu3 %v605_v45  ;;  %637 = vmatmul.f32.vlgmr.msra.gmra.mxu0 %v471_v27 }
  0xa0   : > { %697 = vmatmul.f32.vlgmr.msra.gmra.mxu3 %v474_v28  ;;  %713 = vmatpush.msrb.mxu0 %v556_v46 }
  0xa1   : > { %732 = vmatpush.msrb.mxu1 %v573_v11  ;;  %754 = vmatpush.msrb.mxu2 %v587_v47 }
  0xa2   : > { %773 = vmatpush.msrb.mxu3 %v604_v13  ;;  %657 = vmatmul.f32.vlgmr.msra.gmra.mxu1 %v472_v29 }
  0xa3   : > { %714 = vmatpush.msrb.mxu0 %v555_v48  ;;  %733 = vmatpush.msrb.mxu1 %v572_v18 }
  0xa4   : > { %755 = vmatpush.msrb.mxu2 %v586_v49  ;;  %774 = vmatpush.msrb.mxu3 %v603_v50 }
  0xa5   : > { %715 = vmatpush.msrb.mxu0 %v554_v51  ;;  %734 = vmatpush.msrb.mxu1 %v571_v30 }
  0xa6   : > { %756 = vmatpush.msrb.mxu2 %v585_v43  ;;  %775 = vmatpush.msrb.mxu3 %v602_v52 }
  0xa7   : > { %757 = vmatmul.f32.vlgmr.msrb.gmra.mxu2 %v483_v53  ;;  %716 = vmatpush.msrb.mxu0 %v553_v54 }
  0xa8   : > { %735 = vmatpush.msrb.mxu1 %v570_v55  ;;  %776 = vmatpush.msrb.mxu3 %v601_v57 }
  0xa9   : > { %717 = vmatmul.f32.vlgmr.msrb.gmra.mxu0 %v481_v58  ;;  %777 = vmatmul.f32.vlgmr.msrb.gmra.mxu3 %v484_v59 }
  0xaa   : > { %736 = vmatpush.msrb.mxu1 %v569_v60  ;;  %804 = vmatpush.msra.mxu0 %v787_v62 }
  0xab   : > { %737 = vmatmul.f32.vlgmr.msrb.gmra.mxu1 %v482_v61 }
  0xac   : > { %805 = vmatpush.msra.mxu0 %v786_v63 }
  0xae   : > { %806 = vmatpush.msra.mxu0 %v785_v0 }
  0xb0   : > { %807 = vmatpush.msra.mxu0 %v784_v1 }
 0x11c   : > { %v638_v3 = vpop.f32.mrf.mxu0 }
 0x11d   : > { %v639_v4 = vadd.f32 %v955_v2, %v638_v3 }
 0x11f   : > { %v658_v5 = vpop.f32.mrf.mxu1 }
 0x120   : > { %v659_v6 = vadd.f32 %v658_v5, %v639_v4  ;;  %v678_v7 = vpop.f32.mrf.mxu2 }
 0x122   : > { %v679_v8 = vadd.f32 %v678_v7, %v659_v6 }
 0x123   : > { %v698_v12 = vpop.f32.mrf.mxu3 }
 0x124   : > { %v699_v14 = vadd.f32 %v698_v12, %v679_v8 }
 0x126   : > { %v718_v15 = vpop.f32.mrf.mxu0 }
 0x127   : > { %v719_v16 = vadd.f32 %v718_v15, %v699_v14 }
 0x128   : > { %v738_v17 = vpop.f32.mrf.mxu1 }
 0x129   : > { %v739_v19 = vadd.f32 %v738_v17, %v719_v16 }
 0x12a   : > { %v758_v21 = vpop.f32.mrf.mxu2 }
 0x12b   : > { %v759_v22 = vadd.f32 %v758_v21, %v739_v19 }
 0x12c   : > { %v778_v23 = vpop.f32.mrf.mxu3 }
 0x12d   : > { %v779_v56 = vadd.f32 %v778_v23, %v759_v22 }
 0x12f   : > { %v782_v20 = vmul.f32 0.01, %v779_v56  ;;  %vm781_vm3 = vcmp.gt.f32.partialorder %v779_v56, 0.0 }
 0x131   : > { %v783_v24 = vsel %vm781_vm3, %v779_v56, %v782_v20 }
 0x132   : > { %900 = vmatmul.msk.f32.vlgmr.msra.gmra.mxu0 %vm788_vm4, %v783_v24 }
 0x1af   : > { %v809_v25 = vpop.f32.mrf.mxu0 }
 0x1b0   : > { %v812_v26 = vadd.f32 %v809_v25, %v779_v56 }
 0x1b2   : > { %814 = vst.msk [vmem:[#allocation5] sm:$0x3] %vm813_vm5, %v812_v26 }
 0x1b3 PF: > { %p910_p11 = scmp.eq.s32.totalorder %s885_s20, 3  ;;  %s825_s17 = sshll.u32 %s1627_s4, 4  ;;  %s826_s17 = int_to_ptr.hbm [resolvable:$true] %s825_s17 }
 0x1b4   : > { %s1030_s25 = smov [#allocation5]  }
 0x1b5   : > { %s823_s26 = sshll.u32 %s1030_s25, 4  ;;  %s824_s26 = int_to_ptr.vmem [resolvable:$true] %s823_s26 }
 0x1b6   : > { %907 = dma.vmem_to_hbm [thread:$0]  (%p910_p11), %s824_s26, 32, %s826_s17, [#allocation6]  }
 0x1b7   : > { %1005 = dma.done.wait (%p910_p11), [#allocation6], 32  }
 0x1b8   : > { %1007 = vsyncadd (%p910_p11), [#allocation6], 4294967264 }
 0x1b9 PF: > { %s15_s19 = sadd.s32 1, %s1026_s19   ;;  %s1636_s15 = smov %s1014_s16 }
 0x1ba   : > { %p12_p12 = scmp.ge.s32.totalorder %s15_s19, 6   ;;  %s1637_s16 = smov %s1092_s24 }
 0x1bb   : > { %s1638_s17 = smov %s1022_s18  ;;  %s1639_s18 = smov %s1641_s21 }
 0x1bc   :  { %14 = sbr.rel (!%p12_p12) target bundleno = 3 (0x3), region = 100 }
 0x1c1   :  { %839 = vsyncpa [#allocation6], 1 }
 0x1c2   :  { %841 = vsyncpa [#allocation6 + $0x1], 1 }

</bundles_post_ra>
